<compile_context>
chip_gen: v6e
topology: v6e:2x2x1
jax: 0.10.0
libtpu: 0.0.40
codegen_flags: <defaults>
</compile_context>

<pallas_src>
import functools

import jax
import jax.numpy as jnp
from jax.experimental import pallas as pl
from jax.experimental.pallas import tpu as pltpu

LANE = 128  # lane (last-dim) granularity
SUB = 8     # sublane granularity for f32


def _round_up(x, m):
    return ((x + m - 1) // m) * m


def mlp_kernel(x_ref, w1_ref, b1_ref, w2_ref, b2_ref, o_ref, *, use_bf16_operands):
    # x_ref:  (TB, Din)        (Din unpadded, full extent)
    # w1_ref: (Din, Dh_p)      b1_ref: (1, Dh_p)
    # w2_ref: (Dh_p, Dout_p)   b2_ref: (1, Dout_p)
    # o_ref:  (TB, Dout_p)
    x = x_ref[...]
    w1 = w1_ref[...]
    w2 = w2_ref[...]

    if use_bf16_operands:
        # Optional MXU-friendly path (numerics deviation from f32 reference).
        x = x.astype(jnp.bfloat16)
        w1 = w1.astype(jnp.bfloat16)
        w2 = w2.astype(jnp.bfloat16)

    # linear1: x @ W1 + b1 (MXU, f32 accumulate)
    h = jnp.dot(x, w1, preferred_element_type=jnp.float32) + b1_ref[...]

    # ReLU (VPU elementwise)
    h = jnp.maximum(h, 0.0)

    # dropout: identity in eval mode (see TODO above)

    if use_bf16_operands:
        h = h.astype(jnp.bfloat16)

    # linear2: h @ W2 + b2 (MXU, f32 accumulate)
    out = jnp.dot(h, w2, preferred_element_type=jnp.float32) + b2_ref[...]
    o_ref[...] = out.astype(o_ref.dtype)


def mlp_forward(x, w1, b1, w2, b2, *, batch_tile=1024, use_bf16_operands=False):
    """Fused MLP forward: linear1 -> relu -> (eval dropout) -> linear2.

    x : (B, input_dim)
    w1: (input_dim, hidden_dim), b1: (hidden_dim,)
    w2: (hidden_dim, output_dim), b2: (output_dim,)
    returns (B, output_dim)
    """
    B, input_dim = x.shape
    hidden_dim = w1.shape[1]
    output_dim = w2.shape[1]

    # Lane-dense padding for the *small* weight/bias tensors only (exact:
    # padded hidden cols get W1-col=0 and b1=0 -> relu(0)=0; padded W2 rows are
    # 0; padded output cols are sliced off).  x / out batch stays unpadded.
    dh_p = _round_up(hidden_dim, LANE)
    dout_p = _round_up(output_dim, LANE)

    # Batch tile: multiple of 8 sublanes.  For B <= batch_tile split into ~2
    # tiles so both v7x TensorCores get work; for larger B use batch_tile.
    if B > batch_tile:
        tb = batch_tile
    else:
        tb = max(SUB, _round_up(pl.cdiv(B, 2), SUB))
    num_tiles = pl.cdiv(B, tb)

    w1_p = jnp.pad(w1, ((0, 0), (0, dh_p - hidden_dim)))
    b1_p = jnp.pad(b1, (0, dh_p - hidden_dim)).reshape(1, dh_p)
    w2_p = jnp.pad(w2, ((0, dh_p - hidden_dim), (0, dout_p - output_dim)))
    b2_p = jnp.pad(b2, (0, dout_p - output_dim)).reshape(1, dout_p)

    kernel = functools.partial(mlp_kernel, use_bf16_operands=use_bf16_operands)

    # Advisory cost estimate for XLA's scheduler around the custom call.
    flops = 2 * B * (input_dim * hidden_dim + hidden_dim * output_dim)
    bytes_accessed = 4 * (B * input_dim + input_dim * dh_p + dh_p
                          + dh_p * dout_p + dout_p + B * dout_p)
    cost = pl.CostEstimate(flops=flops, transcendentals=0,
                           bytes_accessed=bytes_accessed)

    # Explicit VMEM budget: x/out double-buffers + (up to) double-buffered
    # weights/biases + f32 intermediate h, with 2x margin + 8 MiB slack.
    itemsize = 4
    est = (2 * tb * (input_dim + dout_p)                               # x/out
           + 2 * (input_dim * dh_p + dh_p + dh_p * dout_p + dout_p)   # weights
           + 2 * tb * dh_p                                            # h + temps
           ) * itemsize
    vmem_limit = int(min(2 * est + (8 << 20), 64 << 20))

    compiler_params = pltpu.CompilerParams(
        # Batch tiles are independent -> shard across v7x's 2 TensorCores
        # (no-op on v5e/v6e).
        dimension_semantics=("parallel",),
        vmem_limit_bytes=vmem_limit,
    )

    x_spec = pl.BlockSpec((tb, input_dim), lambda i: (i, 0))
    out_spec = pl.BlockSpec((tb, dout_p), lambda i: (i, 0))

    def _call(single_buffer_weights):
        if single_buffer_weights:
            # Constant-index blocks never change across grid steps -> single
            # buffer (halves resident-weight VMEM).
            def const_spec(shape):
                return pl.BlockSpec(shape, lambda i: (0,) * len(shape),
                                    pipeline_mode=pl.Buffered(1))
        else:
            def const_spec(shape):
                return pl.BlockSpec(shape, lambda i: (0,) * len(shape))

        return pl.pallas_call(
            kernel,
            out_shape=jax.ShapeDtypeStruct((B, dout_p), x.dtype),
            grid=(num_tiles,),
            in_specs=[
                x_spec,
                const_spec(w1_p.shape),
                const_spec(b1_p.shape),
                const_spec(w2_p.shape),
                const_spec(b2_p.shape),
            ],
            out_specs=out_spec,
            compiler_params=compiler_params,
            cost_estimate=cost,
        )(x, w1_p, b1_p, w2_p, b2_p)

    try:
        out_p = _call(True)
    except Exception:
        # pl.Buffered(1) not accepted by this JAX/Mosaic version -> default
        # double-buffered constant blocks (correctness identical).
        out_p = _call(False)

    # Strip only the (small) output feature padding; batch is unpadded.
    if dout_p != output_dim:
        return out_p[:, :output_dim]
    return out_p


def _reference(x, w1, b1, w2, b2):
    h = jnp.maximum(x @ w1 + b1, 0.0)
    return h @ w2 + b2


if __name__ == "__main__":
    # Shapes consistent with MLP(input_dim=16, hidden_dim=32, output_dim=8).
    batch, input_dim, hidden_dim, output_dim = 8, 16, 32, 8

    key = jax.random.PRNGKey(0)
    kx, kw1, kb1, kw2, kb2 = jax.random.split(key, 5)

    x = jax.random.normal(kx, (batch, input_dim), dtype=jnp.float32)

    # Deterministic synthetic parameters (uniform, matching nn.Linear init
    # scale 1/sqrt(fan_in)); stored already transposed to (in, out).
    bound1 = 1.0 / (input_dim ** 0.5)
    bound2 = 1.0 / (hidden_dim ** 0.5)
    w1 = jax.random.uniform(kw1, (input_dim, hidden_dim), jnp.float32, -bound1, bound1)
    b1 = jax.random.uniform(kb1, (hidden_dim,), jnp.float32, -bound1, bound1)
    w2 = jax.random.uniform(kw2, (hidden_dim, output_dim), jnp.float32, -bound2, bound2)
    b2 = jax.random.uniform(kb2, (output_dim,), jnp.float32, -bound2, bound2)

    # Case 1: batch fits in a single tile.
    out = jax.block_until_ready(mlp_forward(x, w1, b1, w2, b2))
    ref = _reference(x, w1, b1, w2, b2)
    assert out.shape == (batch, output_dim)
    assert jnp.allclose(out, ref, atol=1e-5, rtol=1e-5), "mismatch vs reference (case 1)"

    # Case 2: ragged batch (exercises the cdiv grid + masked last tile).
    batch2 = 20
    x2 = jax.random.normal(jax.random.PRNGKey(1), (batch2, input_dim), dtype=jnp.float32)
    out2 = jax.block_until_ready(mlp_forward(x2, w1, b1, w2, b2))
    ref2 = _reference(x2, w1, b1, w2, b2)
    assert out2.shape == (batch2, output_dim)
    assert jnp.allclose(out2, ref2, atol=1e-5, rtol=1e-5), "mismatch vs reference (case 2)"

    print("KERNEL_OK")
</pallas_src>

<mosaic_0001>
module attributes {stable_mosaic.version = 11 : i64} {
  func.func @mlp_kernel(%arg0: i32, %arg1: memref<8x16xf32, #tpu.memory_space<vmem>>, %arg2: memref<16x128xf32, #tpu.memory_space<vmem>>, %arg3: memref<1x128xf32, #tpu.memory_space<vmem>>, %arg4: memref<128x128xf32, #tpu.memory_space<vmem>>, %arg5: memref<1x128xf32, #tpu.memory_space<vmem>>, %arg6: memref<8x128xf32, #tpu.memory_space<vmem>>) attributes {dimension_semantics = [#tpu.dimension_semantics<parallel>], iteration_bounds = array<i64: 1>, scalar_prefetch = 0 : i64, scratch_operands = 0 : i64, tpu.core_type = #tpu.core_type<tc>, window_params = [{transform_indices = @transform_0, window_bounds = array<i64: 8, 16>}, {pipeline_mode = #tpu.pipeline_mode<synchronous>, transform_indices = @transform_1, window_bounds = array<i64: 16, 128>}, {pipeline_mode = #tpu.pipeline_mode<synchronous>, transform_indices = @transform_2, window_bounds = array<i64: 1, 128>}, {pipeline_mode = #tpu.pipeline_mode<synchronous>, transform_indices = @transform_3, window_bounds = array<i64: 128, 128>}, {pipeline_mode = #tpu.pipeline_mode<synchronous>, transform_indices = @transform_4, window_bounds = array<i64: 1, 128>}, {transform_indices = @transform_5, window_bounds = array<i64: 8, 128>}]} {
    %c0 = arith.constant 0 : index
    %c0_0 = arith.constant 0 : index
    %0 = vector.load %arg1[%c0, %c0_0] : memref<8x16xf32, #tpu.memory_space<vmem>>, vector<8x16xf32>
    %c0_1 = arith.constant 0 : index
    %c0_2 = arith.constant 0 : index
    %1 = vector.load %arg2[%c0_1, %c0_2] : memref<16x128xf32, #tpu.memory_space<vmem>>, vector<16x128xf32>
    %c0_3 = arith.constant 0 : index
    %c0_4 = arith.constant 0 : index
    %2 = vector.load %arg4[%c0_3, %c0_4] : memref<128x128xf32, #tpu.memory_space<vmem>>, vector<128x128xf32>
    %cst = arith.constant dense<0.000000e+00> : vector<8x128xf32>
    %3 = tpu.matmul %0, %1, %cst {dimension_numbers = #tpu.dot_dimension_numbers<[1], [0], [0], [1], [0, 0, 1, 1], [], []>} : vector<8x16xf32>, vector<16x128xf32>, vector<8x128xf32> -> vector<8x128xf32>
    %c0_5 = arith.constant 0 : index
    %c0_6 = arith.constant 0 : index
    %4 = vector.load %arg3[%c0_5, %c0_6] : memref<1x128xf32, #tpu.memory_space<vmem>>, vector<1x128xf32>
    %5 = vector.broadcast %4 : vector<1x128xf32> to vector<8x128xf32>
    %6 = arith.addf %3, %5 : vector<8x128xf32>
    %cst_7 = arith.constant 0.000000e+00 : f32
    %7 = vector.broadcast %cst_7 : f32 to vector<8x128xf32>
    %8 = arith.maximumf %6, %7 : vector<8x128xf32>
    %cst_8 = arith.constant dense<0.000000e+00> : vector<8x128xf32>
    %9 = tpu.matmul %8, %2, %cst_8 {dimension_numbers = #tpu.dot_dimension_numbers<[1], [0], [0], [1], [0, 0, 1, 1], [], []>} : vector<8x128xf32>, vector<128x128xf32>, vector<8x128xf32> -> vector<8x128xf32>
    %c0_9 = arith.constant 0 : index
    %c0_10 = arith.constant 0 : index
    %10 = vector.load %arg5[%c0_9, %c0_10] : memref<1x128xf32, #tpu.memory_space<vmem>>, vector<1x128xf32>
    %11 = vector.broadcast %10 : vector<1x128xf32> to vector<8x128xf32>
    %12 = arith.addf %9, %11 : vector<8x128xf32>
    %c0_11 = arith.constant 0 : index
    %c0_12 = arith.constant 0 : index
    %13 = vector.load %arg6[%c0_11, %c0_12] : memref<8x128xf32, #tpu.memory_space<vmem>>, vector<8x128xf32>
    tpu.vector_store %arg6[%c0_11, %c0_12], %12 {strides = array<i32>} : memref<8x128xf32, #tpu.memory_space<vmem>>, vector<8x128xf32>,
    return
  }
  func.func @transform_0(%arg0: i32) -> (i32, i32) {
    %c0_i32 = arith.constant 0 : i32
    %c0_i32_0 = arith.constant 0 : i32
    return %arg0, %c0_i32 : i32, i32
  }
  func.func @transform_1(%arg0: i32) -> (i32, i32) {
    %c0_i32 = arith.constant 0 : i32
    %c0_i32_0 = arith.constant 0 : i32
    %c0_i32_1 = arith.constant 0 : i32
    return %c0_i32, %c0_i32_0 : i32, i32
  }
  func.func @transform_2(%arg0: i32) -> (i32, i32) {
    %c0_i32 = arith.constant 0 : i32
    %c0_i32_0 = arith.constant 0 : i32
    %c0_i32_1 = arith.constant 0 : i32
    return %c0_i32, %c0_i32_0 : i32, i32
  }
  func.func @transform_3(%arg0: i32) -> (i32, i32) {
    %c0_i32 = arith.constant 0 : i32
    %c0_i32_0 = arith.constant 0 : i32
    %c0_i32_1 = arith.constant 0 : i32
    return %c0_i32, %c0_i32_0 : i32, i32
  }
  func.func @transform_4(%arg0: i32) -> (i32, i32) {
    %c0_i32 = arith.constant 0 : i32
    %c0_i32_0 = arith.constant 0 : i32
    %c0_i32_1 = arith.constant 0 : i32
    return %c0_i32, %c0_i32_0 : i32, i32
  }
  func.func @transform_5(%arg0: i32) -> (i32, i32) {
    %c0_i32 = arith.constant 0 : i32
    %c0_i32_0 = arith.constant 0 : i32
    return %arg0, %c0_i32 : i32, i32
  }
}

module attributes {stable_mosaic.version = 11 : i64} {
  func.func @mlp_kernel(%arg0: i32, %arg1: memref<8x16xf32, #tpu.memory_space<vmem>>, %arg2: memref<16x128xf32, #tpu.memory_space<vmem>>, %arg3: memref<1x128xf32, #tpu.memory_space<vmem>>, %arg4: memref<128x128xf32, #tpu.memory_space<vmem>>, %arg5: memref<1x128xf32, #tpu.memory_space<vmem>>, %arg6: memref<8x128xf32, #tpu.memory_space<vmem>>) attributes {dimension_semantics = [#tpu.dimension_semantics<parallel>], iteration_bounds = array<i64: 1>, scalar_prefetch = 0 : i64, scratch_operands = 0 : i64, tpu.core_type = #tpu.core_type<tc>, window_params = [{transform_indices = @transform_0, window_bounds = array<i64: 8, 16>}, {pipeline_mode = #tpu.pipeline_mode<synchronous>, transform_indices = @transform_1, window_bounds = array<i64: 16, 128>}, {pipeline_mode = #tpu.pipeline_mode<synchronous>, transform_indices = @transform_2, window_bounds = array<i64: 1, 128>}, {pipeline_mode = #tpu.pipeline_mode<synchronous>, transform_indices = @transform_3, window_bounds = array<i64: 128, 128>}, {pipeline_mode = #tpu.pipeline_mode<synchronous>, transform_indices = @transform_4, window_bounds = array<i64: 1, 128>}, {transform_indices = @transform_5, window_bounds = array<i64: 8, 128>}]} {
    %c0 = arith.constant 0 : index
    %c0_0 = arith.constant 0 : index
    %0 = vector.load %arg1[%c0, %c0_0] : memref<8x16xf32, #tpu.memory_space<vmem>>, vector<8x16xf32>
    %c0_1 = arith.constant 0 : index
    %c0_2 = arith.constant 0 : index
    %1 = vector.load %arg2[%c0_1, %c0_2] : memref<16x128xf32, #tpu.memory_space<vmem>>, vector<16x128xf32>
    %c0_3 = arith.constant 0 : index
    %c0_4 = arith.constant 0 : index
    %2 = vector.load %arg4[%c0_3, %c0_4] : memref<128x128xf32, #tpu.memory_space<vmem>>, vector<128x128xf32>
    %cst = arith.constant dense<0.000000e+00> : vector<8x128xf32>
    %3 = tpu.matmul %0, %1, %cst {dimension_numbers = #tpu.dot_dimension_numbers<[1], [0], [0], [1], [0, 0, 1, 1], [], []>} : vector<8x16xf32>, vector<16x128xf32>, vector<8x128xf32> -> vector<8x128xf32>
    %c0_5 = arith.constant 0 : index
    %c0_6 = arith.constant 0 : index
    %4 = vector.load %arg3[%c0_5, %c0_6] : memref<1x128xf32, #tpu.memory_space<vmem>>, vector<1x128xf32>
    %5 = vector.broadcast %4 : vector<1x128xf32> to vector<8x128xf32>
    %6 = arith.addf %3, %5 : vector<8x128xf32>
    %cst_7 = arith.constant 0.000000e+00 : f32
    %7 = vector.broadcast %cst_7 : f32 to vector<8x128xf32>
    %8 = arith.maximumf %6, %7 : vector<8x128xf32>
    %cst_8 = arith.constant dense<0.000000e+00> : vector<8x128xf32>
    %9 = tpu.matmul %8, %2, %cst_8 {dimension_numbers = #tpu.dot_dimension_numbers<[1], [0], [0], [1], [0, 0, 1, 1], [], []>} : vector<8x128xf32>, vector<128x128xf32>, vector<8x128xf32> -> vector<8x128xf32>
    %c0_9 = arith.constant 0 : index
    %c0_10 = arith.constant 0 : index
    %10 = vector.load %arg5[%c0_9, %c0_10] : memref<1x128xf32, #tpu.memory_space<vmem>>, vector<1x128xf32>
    %11 = vector.broadcast %10 : vector<1x128xf32> to vector<8x128xf32>
    %12 = arith.addf %9, %11 : vector<8x128xf32>
    %c0_11 = arith.constant 0 : index
    %c0_12 = arith.constant 0 : index
    %13 = vector.load %arg6[%c0_11, %c0_12] : memref<8x128xf32, #tpu.memory_space<vmem>>, vector<8x128xf32>
    tpu.vector_store %arg6[%c0_11, %c0_12], %12 {strides = array<i32>} : memref<8x128xf32, #tpu.memory_space<vmem>>, vector<8x128xf32>,
    return
  }
  func.func @transform_0(%arg0: i32) -> (i32, i32) {
    %c0_i32 = arith.constant 0 : i32
    %c0_i32_0 = arith.constant 0 : i32
    return %arg0, %c0_i32 : i32, i32
  }
  func.func @transform_1(%arg0: i32) -> (i32, i32) {
    %c0_i32 = arith.constant 0 : i32
    %c0_i32_0 = arith.constant 0 : i32
    %c0_i32_1 = arith.constant 0 : i32
    return %c0_i32, %c0_i32_0 : i32, i32
  }
  func.func @transform_2(%arg0: i32) -> (i32, i32) {
    %c0_i32 = arith.constant 0 : i32
    %c0_i32_0 = arith.constant 0 : i32
    %c0_i32_1 = arith.constant 0 : i32
    return %c0_i32, %c0_i32_0 : i32, i32
  }
  func.func @transform_3(%arg0: i32) -> (i32, i32) {
    %c0_i32 = arith.constant 0 : i32
    %c0_i32_0 = arith.constant 0 : i32
    %c0_i32_1 = arith.constant 0 : i32
    return %c0_i32, %c0_i32_0 : i32, i32
  }
  func.func @transform_4(%arg0: i32) -> (i32, i32) {
    %c0_i32 = arith.constant 0 : i32
    %c0_i32_0 = arith.constant 0 : i32
    %c0_i32_1 = arith.constant 0 : i32
    return %c0_i32, %c0_i32_0 : i32, i32
  }
  func.func @transform_5(%arg0: i32) -> (i32, i32) {
    %c0_i32 = arith.constant 0 : i32
    %c0_i32_0 = arith.constant 0 : i32
    return %arg0, %c0_i32 : i32, i32
  }
}

</mosaic_0001>

<bundles_post_ra>
// kernel: tpu_custom_call.1
= control target key start
LH: loop header
LB: loop body
LE: loop exit
PB: predicated region body
PF: predicated region fallthrough
CT: control target
= control target key end

     0   :  { %10 = vsyncpa [#allocation3], 0  ;;  %s470_s0 = inlined_call_operand.hbm [shape: f32[8,16], index: 0, kind: input, shape index: {}]   ;;  %s471_s1 = inlined_call_operand.hbm [shape: f32[16,128], index: 1, kind: input, shape index: {}]   ;;  %s472_s2 = inlined_call_operand.vmem [shape: f32[1,128], index: 2, kind: input, shape index: {}]   ;;  %s473_s3 = inlined_call_operand.hbm [shape: f32[128,128], index: 3, kind: input, shape index: {}]   ;;  %s474_s4 = inlined_call_operand.vmem [shape: f32[1,128], index: 4, kind: input, shape index: {}]   ;;  %s475_s5 = inlined_call_operand.hbm [shape: f32[8,128], index: 5, kind: output, shape index: {}]  }
   0x1   :  { %11 = vsyncpa [#allocation6], 0 }
   0x2   :  { %12 = vsyncpa [#allocation4], 0  ;;  %s414_s18 = smov [#allocation5]  }
   0x3   :  { %s28_s19 = sshll.u32 %s414_s18, 4  ;;  %s29_s19 = int_to_ptr.vmem [resolvable:$true] %s28_s19 }
   0x4   :  { %s336_s20 = scalar_lea.vmem %s29_s19, 256  ;;  %p341_p1 = scmp.lt.s32.totalorder %s29_s19, %s29_s19 }
   0x5   :  { %p337_p0 = scmp.ne.s32.totalorder %s29_s19, %s336_s20  ;;  %p342_p2 = scmp.lt.s32.totalorder %s336_s20, %s336_s20 }
   0x7   :  { %p343_p3 = por %p342_p2, %p341_p1 }
   0x9   :  { %p344_p4 = pnand %p343_p3, %p337_p0 }
   0xb   :  { %347 = shalt.err (!%p344_p4)
}
   0xc   :  { %s415_s21 = smov 128   ;;  %s416_s22 = smov 8  }
   0xd   :  { %34 = dma.hbm_to_vmem [thread:$0]  %s471_s1, 256, %s29_s19, [#allocation6], %s415_s21, %s415_s21, %s416_s22  }
   0xe   :  { %s417_s25 = smov [#allocation2]   ;;  %s418_s27 = smov [#allocation7]  }
   0xf   :  { %s19_s26 = sshll.u32 %s417_s25, 4  ;;  %s42_s28 = sshll.u32 %s418_s27, 4  ;;  %s20_s26 = int_to_ptr.vmem [resolvable:$true] %s19_s26  ;;  %s43_s28 = int_to_ptr.vmem [resolvable:$true] %s42_s28 }
  0x10   :  { %s356_s29 = scalar_lea.vmem %s20_s26, 128  ;;  %p361_p6 = scmp.lt.s32.totalorder %s20_s26, %s20_s26 }
  0x11   :  { %p357_p5 = scmp.ne.s32.totalorder %s20_s26, %s356_s29  ;;  %p362_p7 = scmp.lt.s32.totalorder %s356_s29, %s356_s29 }
  0x13   :  { %p363_p8 = por %p362_p7, %p361_p6 }
  0x15   :  { %p364_p9 = pnand %p363_p8, %p357_p5 }
  0x17   :  { %367 = shalt.err (!%p364_p9)
}
  0x18   :  { %22 = dma.hbm_to_vmem [thread:$0]  %s470_s0, 128, %s20_s26, [#allocation3]  }
  0x19   :  { %s376_s7 = scalar_lea.vmem %s43_s28, 2048  ;;  %p381_p11 = scmp.lt.s32.totalorder %s43_s28, %s43_s28 }
  0x1a   :  { %p377_p10 = scmp.ne.s32.totalorder %s43_s28, %s376_s7  ;;  %p382_p12 = scmp.lt.s32.totalorder %s376_s7, %s376_s7 }
  0x1c   :  { %p383_p13 = por %p382_p12, %p381_p11 }
  0x1e   :  { %p384_p0 = pnand %p383_p13, %p377_p10 }
  0x20   :  { %387 = shalt.err (!%p384_p0)
}
  0x21   :  { %48 = dma.hbm_to_vmem [thread:$0]  %s473_s3, 2048, %s43_s28, [#allocation6], %s415_s21, %s415_s21, %s416_s22  }
  0x22   :  { %408 = dma.done.wait [#allocation3], 128  }
  0x23   :  { %409 = vsyncadd [#allocation3], 4294967168 }
  0x24   :  { %410 = dma.done.wait [#allocation6], 2304  }
  0x25   :  { %411 = vsyncadd [#allocation6], 4294964992  ;;  %v419_v0 = vmov 0.0   ;;  %vm420_vm0 = vmmov 0   ;;  %v62_v1 = vld [vmem:[#allocation5 + $0x8] sm:$0xff]  ;;  %v61_v2 = vld [vmem:[#allocation5] sm:$0xff] }
  0x26   :  { %278 = vmatprep.subr.mxu0 %v419_v0  ;;  %282 = vmatprep.mubr.msk.f32.mxu0 %vm420_vm0, %v419_v0  ;;  %v60_v3 = vld [vmem:[#allocation2] sm:$0xff]  ;;  %vm86_vm1 = vcmask 130048   ;;  %v78_v4 = vld [vmem:[#allocation7 + $0x78] sm:$0xff]  ;;  %v77_v5 = vld [vmem:[#allocation7 + $0x70] sm:$0xff]  ;;  %s421_s11 = smov [#allocation8]  }
  0x27   :  { %285 = vmatprep.subr.mxu1 %v419_v0  ;;  %317 = vmatprep.mubr.msk.f32.mxu1 %vm420_vm0, %v419_v0  ;;  %v76_v6 = vld [vmem:[#allocation7 + $0x68] sm:$0xff]  ;;  %v75_v7 = vld [vmem:[#allocation7 + $0x60] sm:$0xff]  ;;  %v74_v8 = vld [vmem:[#allocation7 + $0x58] sm:$0xff]  ;;  %s245_s12 = sshll.u32 %s421_s11, 4  ;;  %s246_s12 = int_to_ptr.vmem [resolvable:$true] %s245_s12 }
  0x28   :  { %279 = vmatpush3.msra.mxu0 %v62_v1  ;;  %286 = vmatpush3.msra.mxu1 %v78_v4  ;;  %v73_v9 = vld [vmem:[#allocation7 + $0x50] sm:$0xff]  ;;  %v72_v10 = vld [vmem:[#allocation7 + $0x48] sm:$0xff]  ;;  %v71_v11 = vld [vmem:[#allocation7 + $0x40] sm:$0xff]  ;;  %s388_s13 = scalar_lea.vmem %s246_s12, 128  ;;  %p393_p2 = scmp.lt.s32.totalorder %s246_s12, %s246_s12 }
  0x29   :  { %280 = vmatprep.subr.mxu0 %v419_v0  ;;  %287 = vmatprep.subr.mxu1 %v419_v0  ;;  %v70_v12 = vld [vmem:[#allocation7 + $0x38] sm:$0xff]  ;;  %v69_v13 = vld [vmem:[#allocation7 + $0x30] sm:$0xff]  ;;  %v68_v14 = vld [vmem:[#allocation7 + $0x28] sm:$0xff]  ;;  %p389_p1 = scmp.ne.s32.totalorder %s246_s12, %s388_s13  ;;  %p394_p3 = scmp.lt.s32.totalorder %s388_s13, %s388_s13 }
  0x2a   :  { %281 = vmatpush3.msra.mxu0 %v61_v2  ;;  %288 = vmatpush3.msra.mxu1 %v77_v5  ;;  %v67_v15 = vld [vmem:[#allocation7 + $0x20] sm:$0xff]  ;;  %v66_v16 = vld [vmem:[#allocation7 + $0x18] sm:$0xff]  ;;  %v65_v17 = vld [vmem:[#allocation7 + $0x10] sm:$0xff] }
  0x2b   :  { %283 = vmatmul.mubr.msk.f32.vlgmr.msra.gmra.mxu0 %vm86_vm1, %v60_v3  ;;  %289 = vmatprep.subr.mxu1 %v419_v0  ;;  %v64_v18 = vld [vmem:[#allocation7 + $0x8] sm:$0xff]  ;;  %v63_v19 = vld [vmem:[#allocation7] sm:$0xff]  ;;  %p395_p4 = por %p394_p3, %p393_p2 }
  0x2c   :  { %290 = vmatpush3.msra.mxu1 %v76_v6  ;;  %v255_v20 = vld [vmem:[%s472_s2] ss:$0 sm:$0xff] }
  0x2d   :  { %291 = vmatprep.subr.mxu1 %v419_v0  ;;  %v257_v25 = vld [vmem:[%s474_s4] ss:$0 sm:$0xff]  ;;  %p396_p5 = pnand %p395_p4, %p389_p1 }
  0x2e   :  { %292 = vmatpush3.msra.mxu1 %v75_v7 }
  0x2f   :  { %293 = vmatprep.subr.mxu1 %v419_v0 }
  0x30   :  { %294 = vmatpush3.msra.mxu1 %v74_v8 }
  0x31   :  { %295 = vmatprep.subr.mxu1 %v419_v0 }
  0x32   :  { %296 = vmatpush3.msra.mxu1 %v73_v9 }
  0x33   :  { %297 = vmatprep.subr.mxu1 %v419_v0 }
  0x34   :  { %298 = vmatpush3.msra.mxu1 %v72_v10 }
  0x35   :  { %299 = vmatprep.subr.mxu1 %v419_v0 }
  0x36   :  { %300 = vmatpush3.msra.mxu1 %v71_v11 }
  0x37   :  { %301 = vmatprep.subr.mxu1 %v419_v0 }
  0x38   :  { %302 = vmatpush3.msra.mxu1 %v70_v12 }
  0x39   :  { %303 = vmatprep.subr.mxu1 %v419_v0 }
  0x3a   :  { %304 = vmatpush3.msra.mxu1 %v69_v13 }
  0x3b   :  { %305 = vmatprep.subr.mxu1 %v419_v0 }
  0x3c   :  { %306 = vmatpush3.msra.mxu1 %v68_v14 }
  0x3d   :  { %307 = vmatprep.subr.mxu1 %v419_v0 }
  0x3e   :  { %308 = vmatpush3.msra.mxu1 %v67_v15 }
  0x3f   :  { %309 = vmatprep.subr.mxu1 %v419_v0 }
  0x40   :  { %310 = vmatpush3.msra.mxu1 %v66_v16 }
  0x41   :  { %311 = vmatprep.subr.mxu1 %v419_v0 }
  0x42   :  { %312 = vmatpush3.msra.mxu1 %v65_v17 }
  0x43   :  { %313 = vmatprep.subr.mxu1 %v419_v0 }
  0x44   :  { %314 = vmatpush3.msra.mxu1 %v64_v18 }
  0x45   :  { %315 = vmatprep.subr.mxu1 %v419_v0 }
  0x46   :  { %316 = vmatpush3.msra.mxu1 %v63_v19 }
  0xeb   :  { %v156_v21 = vpop.f32.mrf.mxu0 }
  0xec   :  { %v157_v22 = vadd.f32 %v255_v20, %v156_v21 }
  0xed   :  { %v284_v23 = vpop.f32.mrf.mxu0 }
  0xee   :  { %v160_v24 = vmax.f32 %v157_v22, 0.0 }
  0xf0   :  { %318 = vmatmul.mubr.f32.vlgmr.msra.gmra.mxu1 %v160_v24 }
 0x1b0   :  { %v234_v26 = vpop.f32.mrf.mxu1 }
 0x1b1   :  { %v235_v27 = vadd.f32 %v257_v25, %v234_v26 }
 0x1b2   :  { %v319_v28 = vpop.f32.mrf.mxu1 }
 0x1b3   :  { %238 = vst [vmem:[#allocation8] sm:$0xff] %v235_v27 }
 0x1b4   :  { %399 = shalt.err (!%p396_p5)
}
 0x1b5   :  { %248 = dma.vmem_to_hbm [thread:$0]  %s246_s12, 128, %s475_s5, [#allocation4]  }
 0x1b6   :  { %412 = dma.done.wait [#allocation4], 128  }
 0x1b7   :  { %413 = vsyncadd [#allocation4], 4294967168 }
 0x1b8   :  { %252 = vsyncpa [#allocation3], 1 }
 0x1b9   :  { %253 = vsyncpa [#allocation6], 1 }
 0x1ba   :  { %254 = vsyncpa [#allocation4], 1 }

// kernel: tpu_custom_call.1
= control target key start
LH: loop header
LB: loop body
LE: loop exit
PB: predicated region body
PF: predicated region fallthrough
CT: control target
= control target key end

     0   :  { %10 = vsyncpa [#allocation3], 0  ;;  %s470_s0 = inlined_call_operand.hbm [shape: f32[8,16], index: 0, kind: input, shape index: {}]   ;;  %s471_s1 = inlined_call_operand.hbm [shape: f32[16,128], index: 1, kind: input, shape index: {}]   ;;  %s472_s2 = inlined_call_operand.vmem [shape: f32[1,128], index: 2, kind: input, shape index: {}]   ;;  %s473_s3 = inlined_call_operand.hbm [shape: f32[128,128], index: 3, kind: input, shape index: {}]   ;;  %s474_s4 = inlined_call_operand.vmem [shape: f32[1,128], index: 4, kind: input, shape index: {}]   ;;  %s475_s5 = inlined_call_operand.hbm [shape: f32[8,128], index: 5, kind: output, shape index: {}]  }
   0x1   :  { %11 = vsyncpa [#allocation6], 0 }
   0x2   :  { %12 = vsyncpa [#allocation4], 0  ;;  %s414_s18 = smov [#allocation5]  }
   0x3   :  { %s28_s19 = sshll.u32 %s414_s18, 4  ;;  %s29_s19 = int_to_ptr.vmem [resolvable:$true] %s28_s19 }
   0x4   :  { %s336_s20 = scalar_lea.vmem %s29_s19, 256  ;;  %p341_p1 = scmp.lt.s32.totalorder %s29_s19, %s29_s19 }
   0x5   :  { %p337_p0 = scmp.ne.s32.totalorder %s29_s19, %s336_s20  ;;  %p342_p2 = scmp.lt.s32.totalorder %s336_s20, %s336_s20 }
   0x7   :  { %p343_p3 = por %p342_p2, %p341_p1 }
   0x9   :  { %p344_p4 = pnand %p343_p3, %p337_p0 }
   0xb   :  { %347 = shalt.err (!%p344_p4)
}
   0xc   :  { %s415_s21 = smov 128   ;;  %s416_s22 = smov 8  }
   0xd   :  { %34 = dma.hbm_to_vmem [thread:$0]  %s471_s1, 256, %s29_s19, [#allocation6], %s415_s21, %s415_s21, %s416_s22  }
   0xe   :  { %s417_s25 = smov [#allocation2]   ;;  %s418_s27 = smov [#allocation7]  }
   0xf   :  { %s19_s26 = sshll.u32 %s417_s25, 4  ;;  %s42_s28 = sshll.u32 %s418_s27, 4  ;;  %s20_s26 = int_to_ptr.vmem [resolvable:$true] %s19_s26  ;;  %s43_s28 = int_to_ptr.vmem [resolvable:$true] %s42_s28 }
  0x10   :  { %s356_s29 = scalar_lea.vmem %s20_s26, 128  ;;  %p361_p6 = scmp.lt.s32.totalorder %s20_s26, %s20_s26 }
  0x11   :  { %p357_p5 = scmp.ne.s32.totalorder %s20_s26, %s356_s29  ;;  %p362_p7 = scmp.lt.s32.totalorder %s356_s29, %s356_s29 }
  0x13   :  { %p363_p8 = por %p362_p7, %p361_p6 }
  0x15   :  { %p364_p9 = pnand %p363_p8, %p357_p5 }
  0x17   :  { %367 = shalt.err (!%p364_p9)
}
  0x18   :  { %22 = dma.hbm_to_vmem [thread:$0]  %s470_s0, 128, %s20_s26, [#allocation3]  }
  0x19   :  { %s376_s7 = scalar_lea.vmem %s43_s28, 2048  ;;  %p381_p11 = scmp.lt.s32.totalorder %s43_s28, %s43_s28 }
  0x1a   :  { %p377_p10 = scmp.ne.s32.totalorder %s43_s28, %s376_s7  ;;  %p382_p12 = scmp.lt.s32.totalorder %s376_s7, %s376_s7 }
  0x1c   :  { %p383_p13 = por %p382_p12, %p381_p11 }
  0x1e   :  { %p384_p0 = pnand %p383_p13, %p377_p10 }
  0x20   :  { %387 = shalt.err (!%p384_p0)
}
  0x21   :  { %48 = dma.hbm_to_vmem [thread:$0]  %s473_s3, 2048, %s43_s28, [#allocation6], %s415_s21, %s415_s21, %s416_s22  }
  0x22   :  { %408 = dma.done.wait [#allocation3], 128  }
  0x23   :  { %409 = vsyncadd [#allocation3], 4294967168 }
  0x24   :  { %410 = dma.done.wait [#allocation6], 2304  }
  0x25   :  { %411 = vsyncadd [#allocation6], 4294964992  ;;  %v419_v0 = vmov 0.0   ;;  %vm420_vm0 = vmmov 0   ;;  %v62_v1 = vld [vmem:[#allocation5 + $0x8] sm:$0xff]  ;;  %v61_v2 = vld [vmem:[#allocation5] sm:$0xff] }
  0x26   :  { %278 = vmatprep.subr.mxu0 %v419_v0  ;;  %282 = vmatprep.mubr.msk.f32.mxu0 %vm420_vm0, %v419_v0  ;;  %v60_v3 = vld [vmem:[#allocation2] sm:$0xff]  ;;  %vm86_vm1 = vcmask 130048   ;;  %v78_v4 = vld [vmem:[#allocation7 + $0x78] sm:$0xff]  ;;  %v77_v5 = vld [vmem:[#allocation7 + $0x70] sm:$0xff]  ;;  %s421_s11 = smov [#allocation8]  }
  0x27   :  { %285 = vmatprep.subr.mxu1 %v419_v0  ;;  %317 = vmatprep.mubr.msk.f32.mxu1 %vm420_vm0, %v419_v0  ;;  %v76_v6 = vld [vmem:[#allocation7 + $0x68] sm:$0xff]  ;;  %v75_v7 = vld [vmem:[#allocation7 + $0x60] sm:$0xff]  ;;  %v74_v8 = vld [vmem:[#allocation7 + $0x58] sm:$0xff]  ;;  %s245_s12 = sshll.u32 %s421_s11, 4  ;;  %s246_s12 = int_to_ptr.vmem [resolvable:$true] %s245_s12 }
  0x28   :  { %279 = vmatpush3.msra.mxu0 %v62_v1  ;;  %286 = vmatpush3.msra.mxu1 %v78_v4  ;;  %v73_v9 = vld [vmem:[#allocation7 + $0x50] sm:$0xff]  ;;  %v72_v10 = vld [vmem:[#allocation7 + $0x48] sm:$0xff]  ;;  %v71_v11 = vld [vmem:[#allocation7 + $0x40] sm:$0xff]  ;;  %s388_s13 = scalar_lea.vmem %s246_s12, 128  ;;  %p393_p2 = scmp.lt.s32.totalorder %s246_s12, %s246_s12 }
  0x29   :  { %280 = vmatprep.subr.mxu0 %v419_v0  ;;  %287 = vmatprep.subr.mxu1 %v419_v0  ;;  %v70_v12 = vld [vmem:[#allocation7 + $0x38] sm:$0xff]  ;;  %v69_v13 = vld [vmem:[#allocation7 + $0x30] sm:$0xff]  ;;  %v68_v14 = vld [vmem:[#allocation7 + $0x28] sm:$0xff]  ;;  %p389_p1 = scmp.ne.s32.totalorder %s246_s12, %s388_s13  ;;  %p394_p3 = scmp.lt.s32.totalorder %s388_s13, %s388_s13 }
  0x2a   :  { %281 = vmatpush3.msra.mxu0 %v61_v2  ;;  %288 = vmatpush3.msra.mxu1 %v77_v5  ;;  %v67_v15 = vld [vmem:[#allocation7 + $0x20] sm:$0xff]  ;;  %v66_v16 = vld [vmem:[#allocation7 + $0x18] sm:$0xff]  ;;  %v65_v17 = vld [vmem:[#allocation7 + $0x10] sm:$0xff] }
  0x2b   :  { %283 = vmatmul.mubr.msk.f32.vlgmr.msra.gmra.mxu0 %vm86_vm1, %v60_v3  ;;  %289 = vmatprep.subr.mxu1 %v419_v0  ;;  %v64_v18 = vld [vmem:[#allocation7 + $0x8] sm:$0xff]  ;;  %v63_v19 = vld [vmem:[#allocation7] sm:$0xff]  ;;  %p395_p4 = por %p394_p3, %p393_p2 }
  0x2c   :  { %290 = vmatpush3.msra.mxu1 %v76_v6  ;;  %v255_v20 = vld [vmem:[%s472_s2] ss:$0 sm:$0xff] }
  0x2d   :  { %291 = vmatprep.subr.mxu1 %v419_v0  ;;  %v257_v25 = vld [vmem:[%s474_s4] ss:$0 sm:$0xff]  ;;  %p396_p5 = pnand %p395_p4, %p389_p1 }
  0x2e   :  { %292 = vmatpush3.msra.mxu1 %v75_v7 }
  0x2f   :  { %293 = vmatprep.subr.mxu1 %v419_v0 }
  0x30   :  { %294 = vmatpush3.msra.mxu1 %v74_v8 }
  0x31   :  { %295 = vmatprep.subr.mxu1 %v419_v0 }
  0x32   :  { %296 = vmatpush3.msra.mxu1 %v73_v9 }
  0x33   :  { %297 = vmatprep.subr.mxu1 %v419_v0 }
  0x34   :  { %298 = vmatpush3.msra.mxu1 %v72_v10 }
  0x35   :  { %299 = vmatprep.subr.mxu1 %v419_v0 }
  0x36   :  { %300 = vmatpush3.msra.mxu1 %v71_v11 }
  0x37   :  { %301 = vmatprep.subr.mxu1 %v419_v0 }
  0x38   :  { %302 = vmatpush3.msra.mxu1 %v70_v12 }
  0x39   :  { %303 = vmatprep.subr.mxu1 %v419_v0 }
  0x3a   :  { %304 = vmatpush3.msra.mxu1 %v69_v13 }
  0x3b   :  { %305 = vmatprep.subr.mxu1 %v419_v0 }
  0x3c   :  { %306 = vmatpush3.msra.mxu1 %v68_v14 }
  0x3d   :  { %307 = vmatprep.subr.mxu1 %v419_v0 }
  0x3e   :  { %308 = vmatpush3.msra.mxu1 %v67_v15 }
  0x3f   :  { %309 = vmatprep.subr.mxu1 %v419_v0 }
  0x40   :  { %310 = vmatpush3.msra.mxu1 %v66_v16 }
  0x41   :  { %311 = vmatprep.subr.mxu1 %v419_v0 }
  0x42   :  { %312 = vmatpush3.msra.mxu1 %v65_v17 }
  0x43   :  { %313 = vmatprep.subr.mxu1 %v419_v0 }
  0x44   :  { %314 = vmatpush3.msra.mxu1 %v64_v18 }
  0x45   :  { %315 = vmatprep.subr.mxu1 %v419_v0 }
  0x46   :  { %316 = vmatpush3.msra.mxu1 %v63_v19 }
  0xeb   :  { %v156_v21 = vpop.f32.mrf.mxu0 }
  0xec   :  { %v157_v22 = vadd.f32 %v255_v20, %v156_v21 }
  0xed   :  { %v284_v23 = vpop.f32.mrf.mxu0 }
  0xee   :  { %v160_v24 = vmax.f32 %v157_v22, 0.0 }
  0xf0   :  { %318 = vmatmul.mubr.f32.vlgmr.msra.gmra.mxu1 %v160_v24 }
 0x1b0   :  { %v234_v26 = vpop.f32.mrf.mxu1 }
 0x1b1   :  { %v235_v27 = vadd.f32 %v257_v25, %v234_v26 }
 0x1b2   :  { %v319_v28 = vpop.f32.mrf.mxu1 }
 0x1b3   :  { %238 = vst [vmem:[#allocation8] sm:$0xff] %v235_v27 }
 0x1b4   :  { %399 = shalt.err (!%p396_p5)
}
 0x1b5   :  { %248 = dma.vmem_to_hbm [thread:$0]  %s246_s12, 128, %s475_s5, [#allocation4]  }
 0x1b6   :  { %412 = dma.done.wait [#allocation4], 128  }
 0x1b7   :  { %413 = vsyncadd [#allocation4], 4294967168 }
 0x1b8   :  { %252 = vsyncpa [#allocation3], 1 }
 0x1b9   :  { %253 = vsyncpa [#allocation6], 1 }
 0x1ba   :  { %254 = vsyncpa [#allocation4], 1 }

</bundles_post_ra>
